<compile_context>
chip_gen: v6e
topology: v6e:2x2x1
jax: 0.10.0
libtpu: 0.0.40
codegen_flags: <defaults>
</compile_context>

<pallas_src>
import functools

import jax
import jax.numpy as jnp
from jax.experimental import pallas as pl
from jax.experimental.pallas import tpu as pltpu


def _round_up(n, m):
    return ((n + m - 1) // m) * m


_SUBLANE_FOR_ITEMSIZE = {4: 8, 2: 16, 1: 32}

# x (as f32 working set) must be at most this big to take the fused VMEM-resident path.
_FUSED_F32_BYTES_LIMIT = 8 << 20          # 8 MiB -> ~24-28 MiB peak VMEM, safe on v7x
_TWO_PASS_BLOCK_BYTES = 4 << 20           # ~4 MiB per row tile -> near HBM roofline
_VMEM_LIMIT_CAP = 48 << 20                # stay <= ~48 MiB per core (v7x has 64 MiB physical)


def _pnorm_reduce(x_f32, p):
    """sum over rows of |x|^p, keepdims -> [1, C]."""
    if p == 1:
        return jnp.sum(jnp.abs(x_f32), axis=0, keepdims=True)
    elif p == 2:
        return jnp.sum(x_f32 * x_f32, axis=0, keepdims=True)
    else:
        return jnp.sum(jnp.abs(x_f32) ** p, axis=0, keepdims=True)


def _finalize_scale(s, p, eps):
    """s = sum |x|^p per channel -> 1 / (eps + s^(1/p))."""
    if p == 1:
        norm = s
    elif p == 2:
        norm = jnp.sqrt(s)
    else:
        norm = s ** (1.0 / p)
    return 1.0 / (jnp.float32(eps) + norm)


# --------------------------------------------------------------------------------------
# Fused fast path: whole x resident in VMEM, single grid step, 1 HBM read + 1 HBM write.
# --------------------------------------------------------------------------------------
def _fused_kernel(x_ref, out_ref, *, p, eps):
    x = x_ref[...].astype(jnp.float32)                         # [N, C]
    scale = _finalize_scale(_pnorm_reduce(x, p), p, eps)       # [1, C]
    out_ref[...] = (x * scale).astype(out_ref.dtype)


# --------------------------------------------------------------------------------------
# Two-pass path for large x.
# --------------------------------------------------------------------------------------
def _pnorm_scale_kernel(x_ref, scale_ref, *, p, eps, n_rows, tm):
    """Accumulate sum_rows |x|^p into the resident (1, C) output; finalize to 1/(eps+norm)."""
    i = pl.program_id(0)

    @pl.when(i == 0)
    def _():
        scale_ref[...] = jnp.zeros_like(scale_ref)

    x = x_ref[...].astype(jnp.float32)                         # [tm, C]
    if n_rows % tm != 0:
        # Ragged last tile: OOB block-read rows are unspecified garbage -> mask to 0
        # (zeros do not change sum |x|^p). Cheap VPU select, kernel stays HBM-bound.
        row = i * tm + jax.lax.broadcasted_iota(jnp.int32, x.shape, 0)
        x = jnp.where(row < n_rows, x, 0.0)

    scale_ref[...] += _pnorm_reduce(x, p)                      # [1, C]

    @pl.when(i == pl.num_programs(0) - 1)
    def _():
        scale_ref[...] = _finalize_scale(scale_ref[...], p, eps)


def _apply_scale_kernel(scale_ref, x_ref, out_ref):
    """out = x * scale (per-channel broadcast); row tiles independent.

    No ragged mask needed: out-of-bounds output-block stores are dropped by the pipeline.
    """
    out_ref[...] = (x_ref[...].astype(jnp.float32) * scale_ref[...]).astype(out_ref.dtype)


def _pick_row_tile(n, c, itemsize, row_tile):
    sub = _SUBLANE_FOR_ITEMSIZE.get(itemsize, 8)
    if row_tile is None:
        tm = (_TWO_PASS_BLOCK_BYTES // (c * itemsize)) // sub * sub
        tm = max(sub, tm)
    else:
        tm = _round_up(max(1, row_tile), sub)
    # Never use a tile larger than the (sublane-rounded) row count.
    tm = min(tm, _round_up(n, sub))
    return tm


@functools.partial(jax.jit, static_argnames=("p", "eps", "row_tile", "allow_fused"))
def pnormalize(x, p=2, eps=1e-5, row_tile=None, allow_fused=True):
    """PNormalize forward for a ptensors value matrix x: [rows, channels]."""
    n, c = x.shape
    itemsize = x.dtype.itemsize
    f32_bytes = n * c * 4

    # ---------------- Fused VMEM-resident path (1R + 1W over HBM) ----------------
    if allow_fused and f32_bytes <= _FUSED_F32_BYTES_LIMIT:
        return pl.pallas_call(
            functools.partial(_fused_kernel, p=p, eps=float(eps)),
            out_shape=jax.ShapeDtypeStruct((n, c), x.dtype),
            compiler_params=pltpu.CompilerParams(vmem_limit_bytes=_VMEM_LIMIT_CAP),
            cost_estimate=pl.CostEstimate(
                flops=3 * n * c + 3 * c,
                transcendentals=2 * c,
                bytes_accessed=2 * n * c * itemsize),
        )(x)

    # ---------------- Two-pass tiled path (2R + 1W over HBM) ----------------
    tm = _pick_row_tile(n, c, itemsize, row_tile)
    n_tiles = pl.cdiv(n, tm)
    tile_bytes = tm * c * itemsize
    vmem_limit = int(min(_VMEM_LIMIT_CAP, max(32 << 20, 6 * tile_bytes)))

    # Pass 1: per-channel scale = 1 / (eps + ||x||_p), reducing over row tiles.
    scale = pl.pallas_call(
        functools.partial(_pnorm_scale_kernel, p=p, eps=float(eps), n_rows=n, tm=tm),
        out_shape=jax.ShapeDtypeStruct((1, c), jnp.float32),
        grid=(n_tiles,),
        in_specs=[pl.BlockSpec((tm, c), lambda i: (i, 0))],
        out_specs=pl.BlockSpec((1, c), lambda i: (0, 0)),      # resident accumulator
        compiler_params=pltpu.CompilerParams(
            dimension_semantics=("arbitrary",),
            vmem_limit_bytes=vmem_limit),
        cost_estimate=pl.CostEstimate(
            flops=2 * n * c + 3 * c,
            transcendentals=2 * c,
            bytes_accessed=n * c * itemsize + c * 4),
    )(x)

    # Pass 2: out = x * scale, row tiles independent ("parallel" -> megacore on v7x).
    out = pl.pallas_call(
        _apply_scale_kernel,
        out_shape=jax.ShapeDtypeStruct((n, c), x.dtype),
        grid=(n_tiles,),
        in_specs=[pl.BlockSpec((1, c), lambda i: (0, 0)),
                  pl.BlockSpec((tm, c), lambda i: (i, 0))],
        out_specs=pl.BlockSpec((tm, c), lambda i: (i, 0)),
        compiler_params=pltpu.CompilerParams(
            dimension_semantics=("parallel",),
            vmem_limit_bytes=vmem_limit),
        cost_estimate=pl.CostEstimate(
            flops=n * c,
            transcendentals=0,
            bytes_accessed=2 * n * c * itemsize + c * 4),
    )(scale, x)

    return out


def _reference(x, p=2, eps=1e-5):
    pnorm = jnp.sum(jnp.abs(x.astype(jnp.float32)) ** p, axis=0) ** (1.0 / p)
    return x * (1.0 / (eps + pnorm))[None, :]


if __name__ == "__main__":
    # rows not a tile/sublane multiple (exercises ragged handling), channels = 128 for
    # lane-dense vregs/stores.
    N, C = 300, 128
    key = jax.random.PRNGKey(0)
    x = jax.random.normal(key, (N, C), dtype=jnp.float32)
    ref = _reference(x, p=2, eps=1e-5)

    # Path 1: fused VMEM-resident fast path (default dispatch at this size).
    out_fused = jax.block_until_ready(pnormalize(x, p=2, eps=1e-5))
    assert out_fused.shape == (N, C)
    assert jnp.allclose(out_fused, ref, atol=1e-5, rtol=1e-5), "fused path mismatch"

    # Path 2: two-pass tiled path with a small row tile to exercise the multi-step,
    # ragged-last-tile reduction grid (3 tiles of 128 rows over 300 rows).
    out_tiled = jax.block_until_ready(
        pnormalize(x, p=2, eps=1e-5, row_tile=128, allow_fused=False))
    assert out_tiled.shape == (N, C)
    assert jnp.allclose(out_tiled, ref, atol=1e-5, rtol=1e-5), "two-pass path mismatch"

    # TODO(synk): ptensors0/1/2 type dispatch and reference-domain bookkeeping live outside
    # the numeric kernel; all three cases reduce to scaling the [rows, channels] value matrix,
    # which is what this kernel implements.
    print("KERNEL_OK")
</pallas_src>

<mosaic_0001>
module attributes {stable_mosaic.version = 11 : i64} {
  func.func @_fused_kernel(%arg0: memref<300x128xf32, #tpu.memory_space<vmem>>, %arg1: memref<300x128xf32, #tpu.memory_space<vmem>>) attributes {dimension_semantics = [], scalar_prefetch = 0 : i64, scratch_operands = 0 : i64, tpu.core_type = #tpu.core_type<tc>} {
    %c0 = arith.constant 0 : index
    %c0_0 = arith.constant 0 : index
    %0 = vector.load %arg0[%c0, %c0_0] : memref<300x128xf32, #tpu.memory_space<vmem>>, vector<300x128xf32>
    %1 = arith.mulf %0, %0 : vector<300x128xf32>
    %cst = arith.constant dense<0.000000e+00> : vector<128xf32>
    %2 = vector.multi_reduction <add>, %1, %cst [0] : vector<300x128xf32> to vector<128xf32>
    %3 = vector.shape_cast %2 : vector<128xf32> to vector<1x128xf32>
    %4 = math.sqrt %3 : vector<1x128xf32>
    %cst_1 = arith.constant 9.99999974E-6 : f32
    %5 = vector.broadcast %cst_1 : f32 to vector<1x128xf32>
    %6 = arith.addf %5, %4 : vector<1x128xf32>
    %cst_2 = arith.constant 1.000000e+00 : f32
    %7 = vector.broadcast %cst_2 : f32 to vector<1x128xf32>
    %8 = arith.divf %7, %6 : vector<1x128xf32>
    %9 = vector.broadcast %8 : vector<1x128xf32> to vector<300x128xf32>
    %10 = arith.mulf %0, %9 : vector<300x128xf32>
    %c0_3 = arith.constant 0 : index
    %c0_4 = arith.constant 0 : index
    %11 = vector.load %arg1[%c0_3, %c0_4] : memref<300x128xf32, #tpu.memory_space<vmem>>, vector<300x128xf32>
    tpu.vector_store %arg1[%c0_3, %c0_4], %10 {strides = array<i32>} : memref<300x128xf32, #tpu.memory_space<vmem>>, vector<300x128xf32>,
    return
  }
}

</mosaic_0001>

<bundles_post_ra>
// kernel: pnormalize.1
= control target key start
LH: loop header
LB: loop body
LE: loop exit
PB: predicated region body
PF: predicated region fallthrough
CT: control target
= control target key end

     0   :  { %6 = vsyncpa [#allocation3], 0  ;;  %s555_s0 = inlined_call_operand.hbm [shape: f32[300,128], index: 0, kind: input, shape index: {}]   ;;  %s556_s1 = inlined_call_operand.hbm [shape: f32[300,128], index: 1, kind: output, shape index: {}]  }
   0x1   :  { %7 = vsyncpa [#allocation4], 0  ;;  %s299_s6 = smov [#allocation2]  }
   0x2   :  { %s13_s7 = sshll.u32 %s299_s6, 4  ;;  %s14_s7 = int_to_ptr.vmem [resolvable:$true] %s13_s7 }
   0x3   :  { %s263_s8 = scalar_lea.vmem %s14_s7, 4864  ;;  %p268_p1 = scmp.lt.s32.totalorder %s14_s7, %s14_s7 }
   0x4   :  { %p264_p0 = scmp.ne.s32.totalorder %s14_s7, %s263_s8  ;;  %p269_p2 = scmp.lt.s32.totalorder %s263_s8, %s263_s8 }
   0x6   :  { %p270_p3 = por %p269_p2, %p268_p1 }
   0x8   :  { %p271_p4 = pnand %p270_p3, %p264_p0 }
   0xa   :  { %274 = shalt.err (!%p271_p4)
}
   0xb   :  { %s300_s9 = smov 128   ;;  %s301_s10 = smov 8  }
   0xc   :  { %19 = dma.hbm_to_vmem [thread:$0]  %s555_s0, 4864, %s14_s7, [#allocation3], %s300_s9, %s300_s9, %s301_s10  }
   0xd   :  { %295 = dma.done.wait [#allocation3], 4864  }
   0xe   :  { %296 = vsyncadd [#allocation3], 4294962432  ;;  %v319_v0 = vld [vmem:[#allocation2] sm:$0xff]  ;;  %v321_v1 = vld [vmem:[#allocation2 + $0x8] sm:$0xff]  ;;  %vm135_vm0 = vcmask 1043456   ;;  %s302_s0 = smov [#allocation5]  }
   0xf   :  { %v323_v2 = vld [vmem:[#allocation2 + $0x10] sm:$0xff]  ;;  %v325_v3 = vld [vmem:[#allocation2 + $0x18] sm:$0xff]  ;;  %v61_v4 = vmul.f32 %v319_v0, %v319_v0  ;;  %v62_v5 = vmul.f32 %v321_v1, %v321_v1  ;;  %v333_v7 = vld [vmem:[#allocation2 + $0x20] sm:$0xff]  ;;  %s235_s13 = sshll.u32 %s302_s0, 4  ;;  %s236_s13 = int_to_ptr.vmem [resolvable:$true] %s235_s13 }
  0x10   :  { %v63_v6 = vmul.f32 %v323_v2, %v323_v2  ;;  %v64_v8 = vmul.f32 %v325_v3, %v325_v3  ;;  %v337_v10 = vld [vmem:[#allocation2 + $0x28] sm:$0xff]  ;;  %v65_v11 = vmul.f32 %v333_v7, %v333_v7  ;;  %v341_v13 = vld [vmem:[#allocation2 + $0x30] sm:$0xff]  ;;  %v345_v16 = vld [vmem:[#allocation2 + $0x38] sm:$0xff]  ;;  %s275_s14 = scalar_lea.vmem %s236_s13, 4864  ;;  %p280_p6 = scmp.lt.s32.totalorder %s236_s13, %s236_s13 }
  0x11   :  { %v99_v9 = vadd.f32 %v62_v5, %v61_v4  ;;  %v66_v14 = vmul.f32 %v337_v10, %v337_v10  ;;  %v67_v17 = vmul.f32 %v341_v13, %v341_v13  ;;  %v349_v19 = vld [vmem:[#allocation2 + $0x40] sm:$0xff]  ;;  %v68_v20 = vmul.f32 %v345_v16, %v345_v16  ;;  %v353_v22 = vld [vmem:[#allocation2 + $0x48] sm:$0xff]  ;;  %v357_v25 = vld [vmem:[#allocation2 + $0x50] sm:$0xff]  ;;  %p276_p5 = scmp.ne.s32.totalorder %s236_s13, %s275_s14  ;;  %p281_p7 = scmp.lt.s32.totalorder %s275_s14, %s275_s14 }
  0x12   :  { %v69_v23 = vmul.f32 %v349_v19, %v349_v19  ;;  %v70_v26 = vmul.f32 %v353_v22, %v353_v22  ;;  %v361_v28 = vld [vmem:[#allocation2 + $0x58] sm:$0xff]  ;;  %v71_v29 = vmul.f32 %v357_v25, %v357_v25  ;;  %v365_v31 = vld [vmem:[#allocation2 + $0x60] sm:$0xff]  ;;  %v369_v34 = vld [vmem:[#allocation2 + $0x68] sm:$0xff] }
  0x13   :  { %v100_v12 = vadd.f32 %v99_v9, %v63_v6  ;;  %v72_v32 = vmul.f32 %v361_v28, %v361_v28  ;;  %v73_v35 = vmul.f32 %v365_v31, %v365_v31  ;;  %v373_v37 = vld [vmem:[#allocation2 + $0x70] sm:$0xff]  ;;  %v74_v38 = vmul.f32 %v369_v34, %v369_v34  ;;  %v377_v40 = vld [vmem:[#allocation2 + $0x78] sm:$0xff]  ;;  %v381_v43 = vld [vmem:[#allocation2 + $0x80] sm:$0xff]  ;;  %p282_p8 = por %p281_p7, %p280_p6 }
  0x14   :  { %v75_v41 = vmul.f32 %v373_v37, %v373_v37  ;;  %v76_v44 = vmul.f32 %v377_v40, %v377_v40  ;;  %v385_v46 = vld [vmem:[#allocation2 + $0x88] sm:$0xff]  ;;  %v77_v47 = vmul.f32 %v381_v43, %v381_v43  ;;  %v389_v49 = vld [vmem:[#allocation2 + $0x90] sm:$0xff]  ;;  %v393_v52 = vld [vmem:[#allocation2 + $0x98] sm:$0xff] }
  0x15   :  { %v101_v15 = vadd.f32 %v100_v12, %v64_v8  ;;  %v78_v50 = vmul.f32 %v385_v46, %v385_v46  ;;  %v79_v53 = vmul.f32 %v389_v49, %v389_v49  ;;  %v397_v55 = vld [vmem:[#allocation2 + $0xa0] sm:$0xff]  ;;  %v80_v56 = vmul.f32 %v393_v52, %v393_v52  ;;  %v401_v58 = vld [vmem:[#allocation2 + $0xa8] sm:$0xff]  ;;  %v405_v61 = vld [vmem:[#allocation2 + $0xb0] sm:$0xff]  ;;  %p283_p9 = pnand %p282_p8, %p276_p5 }
  0x16   :  { %v81_v59 = vmul.f32 %v397_v55, %v397_v55  ;;  %v82_v62 = vmul.f32 %v401_v58, %v401_v58  ;;  %v409_v4 = vld [vmem:[#allocation2 + $0xb8] sm:$0xff]  ;;  %v83_v5 = vmul.f32 %v405_v61, %v405_v61  ;;  %v413_v8 = vld [vmem:[#allocation2 + $0xc0] sm:$0xff]  ;;  %v417_v12 = vld [vmem:[#allocation2 + $0xc8] sm:$0xff] }
  0x17   :  { %v102_v18 = vadd.f32 %v101_v15, %v65_v11  ;;  %v84_v9 = vmul.f32 %v409_v4, %v409_v4 }
  0x19   :  { %v103_v21 = vadd.f32 %v102_v18, %v66_v14  ;;  %v85_v14 = vmul.f32 %v413_v8, %v413_v8  ;;  %v86_v18 = vmul.f32 %v417_v12, %v417_v12 }
  0x1b   :  { %v104_v24 = vadd.f32 %v103_v21, %v67_v17  ;;  %v421_v17 = vld [vmem:[#allocation2 + $0xd0] sm:$0xff]  ;;  %v425_v21 = vld [vmem:[#allocation2 + $0xd8] sm:$0xff] }
  0x1d   :  { %v105_v27 = vadd.f32 %v104_v24, %v68_v20 }
  0x1f   :  { %v106_v30 = vadd.f32 %v105_v27, %v69_v23  ;;  %v87_v23 = vmul.f32 %v421_v17, %v421_v17  ;;  %v88_v27 = vmul.f32 %v425_v21, %v425_v21 }
  0x21   :  { %v107_v33 = vadd.f32 %v106_v30, %v70_v26  ;;  %v429_v26 = vld [vmem:[#allocation2 + $0xe0] sm:$0xff]  ;;  %v433_v30 = vld [vmem:[#allocation2 + $0xe8] sm:$0xff] }
  0x23   :  { %v108_v36 = vadd.f32 %v107_v33, %v71_v29 }
  0x25   :  { %v109_v39 = vadd.f32 %v108_v36, %v72_v32  ;;  %v89_v32 = vmul.f32 %v429_v26, %v429_v26  ;;  %v90_v36 = vmul.f32 %v433_v30, %v433_v30 }
  0x27   :  { %v110_v42 = vadd.f32 %v109_v39, %v73_v35  ;;  %v437_v35 = vld [vmem:[#allocation2 + $0xf0] sm:$0xff]  ;;  %v441_v39 = vld [vmem:[#allocation2 + $0xf8] sm:$0xff] }
  0x29   :  { %v111_v45 = vadd.f32 %v110_v42, %v74_v38 }
  0x2b   :  { %v112_v48 = vadd.f32 %v111_v45, %v75_v41  ;;  %v91_v41 = vmul.f32 %v437_v35, %v437_v35  ;;  %v92_v45 = vmul.f32 %v441_v39, %v441_v39 }
  0x2d   :  { %v113_v51 = vadd.f32 %v112_v48, %v76_v44  ;;  %v445_v44 = vld [vmem:[#allocation2 + $0x100] sm:$0xff]  ;;  %v449_v48 = vld [vmem:[#allocation2 + $0x108] sm:$0xff] }
  0x2f   :  { %v114_v54 = vadd.f32 %v113_v51, %v77_v47 }
  0x31   :  { %v115_v57 = vadd.f32 %v114_v54, %v78_v50  ;;  %v93_v50 = vmul.f32 %v445_v44, %v445_v44  ;;  %v94_v54 = vmul.f32 %v449_v48, %v449_v48 }
  0x33   :  { %v116_v60 = vadd.f32 %v115_v57, %v79_v53  ;;  %v453_v53 = vld [vmem:[#allocation2 + $0x110] sm:$0xff]  ;;  %v457_v57 = vld [vmem:[#allocation2 + $0x118] sm:$0xff] }
  0x35   :  { %v117_v63 = vadd.f32 %v116_v60, %v80_v56  ;;  %v95_v60 = vmul.f32 %v453_v53, %v453_v53 }
  0x37   :  { %v118_v6 = vadd.f32 %v117_v63, %v81_v59  ;;  %v459_v59 = vld [vmem:[#allocation2 + $0x128] sm:$0xf]  ;;  %v463_v63 = vld [vmem:[#allocation2 + $0x120] sm:$0xff] }
  0x39   :  { %v119_v11 = vadd.f32 %v118_v6, %v82_v62 }
  0x3b   :  { %v120_v15 = vadd.f32 %v119_v11, %v83_v5  ;;  %v96_v5 = vmul.f32 %v457_v57, %v457_v57  ;;  %v97_v11 = vmul.f32 %v463_v63, %v463_v63 }
  0x3d   :  { %v121_v20 = vadd.f32 %v120_v15, %v84_v9  ;;  %v98_v9 = vmul.f32 %v459_v59, %v459_v59 }
  0x3f   :  { %v122_v24 = vadd.f32 %v121_v20, %v85_v14 }
  0x41   :  { %v123_v29 = vadd.f32 %v122_v24, %v86_v18  ;;  %v136_v18 = vsel %vm135_vm0, %v98_v9, 0.0 }
  0x43   :  { %v124_v33 = vadd.f32 %v123_v29, %v87_v23 }
  0x45   :  { %v125_v38 = vadd.f32 %v124_v33, %v88_v27 }
  0x47   :  { %v126_v42 = vadd.f32 %v125_v38, %v89_v32 }
  0x49   :  { %v127_v47 = vadd.f32 %v126_v42, %v90_v36 }
  0x4b   :  { %v128_v51 = vadd.f32 %v127_v47, %v91_v41 }
  0x4d   :  { %v129_v56 = vadd.f32 %v128_v51, %v92_v45 }
  0x4f   :  { %v130_v62 = vadd.f32 %v129_v56, %v93_v50 }
  0x51   :  { %v131_v6 = vadd.f32 %v130_v62, %v94_v54 }
  0x53   :  { %v132_v14 = vadd.f32 %v131_v6, %v95_v60 }
  0x55   :  { %v133_v15 = vadd.f32 %v132_v14, %v96_v5 }
  0x57   :  { %v134_v20 = vadd.f32 %v133_v15, %v97_v11 }
  0x59   :  { %v137_v23 = vadd.f32 %v136_v18, %v134_v20 }
  0x5b   :  { %v138_v24 = vrot.slane %v137_v23, 4 }
  0x5d   :  { %v139_v27 = vadd.f32 %v138_v24, %v137_v23 }
  0x5f   :  { %v140_v29 = vrot.slane %v139_v27, 2 }
  0x61   :  { %v141_v32 = vadd.f32 %v140_v29, %v139_v27 }
  0x63   :  { %v142_v33 = vrot.slane %v141_v32, 1 }
  0x65   :  { %v143_v36 = vadd.f32 %v142_v33, %v141_v32 }
  0x67   :  { %251 = vrsqrt.f32 %v143_v36  ;;  %vm146_vm1 = vcmp.eq.f32.partialorder %v143_v36, inf  ;;  %v149_v41 = vand.u32 2147483648, %v143_v36  ;;  %vm148_vm2 = vcmp.eq.f32.partialorder %v143_v36, 0.0 }
  0x74   :  { %v252_v38 = vpop.eup %251 }
  0x75   :  { %v145_v42 = vmul.f32 %v252_v38, %v143_v36 }
  0x77   :  { %v147_v45 = vsel %vm146_vm1, %v143_v36, %v145_v42 }
  0x78   :  { %v150_v47 = vsel %vm148_vm2, %v149_v41, %v147_v45 }
  0x79   :  { %v151_v50 = vadd.f32 1e-05, %v150_v47 }
  0x7b   :  { %253 = vrcp.f32 %v151_v50 }
  0x88   :  { %v471_v51 = vpop.eup %253 }
  0x89   :  { %v154_v54 = vmul.f32 %v471_v51, %v319_v0  ;;  %v155_v56 = vmul.f32 %v471_v51, %v321_v1  ;;  %v156_v60 = vmul.f32 %v471_v51, %v323_v2  ;;  %v157_v62 = vmul.f32 %v471_v51, %v325_v3 }
  0x8a   :  { %v158_v5 = vmul.f32 %v471_v51, %v333_v7  ;;  %v159_v6 = vmul.f32 %v471_v51, %v337_v10  ;;  %v160_v9 = vmul.f32 %v471_v51, %v341_v13  ;;  %v161_v0 = vmul.f32 %v471_v51, %v345_v16 }
  0x8b   :  { %192 = vst [vmem:[#allocation5] sm:$0xff] %v154_v54  ;;  %193 = vst [vmem:[#allocation5 + $0x8] sm:$0xff] %v155_v56  ;;  %v162_v1 = vmul.f32 %v471_v51, %v349_v19  ;;  %v163_v2 = vmul.f32 %v471_v51, %v353_v22  ;;  %v164_v3 = vmul.f32 %v471_v51, %v357_v25 }
  0x8c   :  { %194 = vst [vmem:[#allocation5 + $0x10] sm:$0xff] %v156_v60  ;;  %195 = vst [vmem:[#allocation5 + $0x18] sm:$0xff] %v157_v62  ;;  %v165_v7 = vmul.f32 %v471_v51, %v361_v28  ;;  %v166_v10 = vmul.f32 %v471_v51, %v365_v31  ;;  %v167_v13 = vmul.f32 %v471_v51, %v369_v34 }
  0x8d   :  { %196 = vst [vmem:[#allocation5 + $0x20] sm:$0xff] %v158_v5  ;;  %197 = vst [vmem:[#allocation5 + $0x28] sm:$0xff] %v159_v6  ;;  %v168_v16 = vmul.f32 %v471_v51, %v373_v37  ;;  %v169_v19 = vmul.f32 %v471_v51, %v377_v40  ;;  %v170_v22 = vmul.f32 %v471_v51, %v381_v43 }
  0x8e   :  { %198 = vst [vmem:[#allocation5 + $0x30] sm:$0xff] %v160_v9  ;;  %199 = vst [vmem:[#allocation5 + $0x38] sm:$0xff] %v161_v0  ;;  %v171_v25 = vmul.f32 %v471_v51, %v385_v46  ;;  %v172_v28 = vmul.f32 %v471_v51, %v389_v49  ;;  %v173_v31 = vmul.f32 %v471_v51, %v393_v52 }
  0x8f   :  { %200 = vst [vmem:[#allocation5 + $0x40] sm:$0xff] %v162_v1  ;;  %201 = vst [vmem:[#allocation5 + $0x48] sm:$0xff] %v163_v2  ;;  %v174_v34 = vmul.f32 %v471_v51, %v397_v55  ;;  %v175_v37 = vmul.f32 %v471_v51, %v401_v58  ;;  %v176_v40 = vmul.f32 %v471_v51, %v405_v61 }
  0x90   :  { %202 = vst [vmem:[#allocation5 + $0x50] sm:$0xff] %v164_v3  ;;  %203 = vst [vmem:[#allocation5 + $0x58] sm:$0xff] %v165_v7  ;;  %v177_v43 = vmul.f32 %v471_v51, %v409_v4  ;;  %v178_v46 = vmul.f32 %v471_v51, %v413_v8  ;;  %v179_v49 = vmul.f32 %v471_v51, %v417_v12 }
  0x91   :  { %204 = vst [vmem:[#allocation5 + $0x60] sm:$0xff] %v166_v10  ;;  %205 = vst [vmem:[#allocation5 + $0x68] sm:$0xff] %v167_v13  ;;  %v180_v52 = vmul.f32 %v471_v51, %v421_v17  ;;  %v181_v55 = vmul.f32 %v471_v51, %v425_v21  ;;  %v182_v58 = vmul.f32 %v471_v51, %v429_v26 }
  0x92   :  { %206 = vst [vmem:[#allocation5 + $0x70] sm:$0xff] %v168_v16  ;;  %207 = vst [vmem:[#allocation5 + $0x78] sm:$0xff] %v169_v19  ;;  %v183_v61 = vmul.f32 %v471_v51, %v433_v30  ;;  %v184_v4 = vmul.f32 %v471_v51, %v437_v35  ;;  %v185_v8 = vmul.f32 %v471_v51, %v441_v39 }
  0x93   :  { %208 = vst [vmem:[#allocation5 + $0x80] sm:$0xff] %v170_v22  ;;  %209 = vst [vmem:[#allocation5 + $0x88] sm:$0xff] %v171_v25  ;;  %v186_v12 = vmul.f32 %v471_v51, %v445_v44  ;;  %v187_v17 = vmul.f32 %v471_v51, %v449_v48  ;;  %v188_v21 = vmul.f32 %v471_v51, %v453_v53 }
  0x94   :  { %210 = vst [vmem:[#allocation5 + $0x90] sm:$0xff] %v172_v28  ;;  %211 = vst [vmem:[#allocation5 + $0x98] sm:$0xff] %v173_v31  ;;  %v189_v26 = vmul.f32 %v471_v51, %v457_v57  ;;  %v190_v30 = vmul.f32 %v471_v51, %v463_v63  ;;  %v191_v35 = vmul.f32 %v471_v51, %v459_v59 }
  0x95   :  { %212 = vst [vmem:[#allocation5 + $0xa0] sm:$0xff] %v174_v34  ;;  %213 = vst [vmem:[#allocation5 + $0xa8] sm:$0xff] %v175_v37 }
  0x96   :  { %214 = vst [vmem:[#allocation5 + $0xb0] sm:$0xff] %v176_v40  ;;  %215 = vst [vmem:[#allocation5 + $0xb8] sm:$0xff] %v177_v43 }
  0x97   :  { %216 = vst [vmem:[#allocation5 + $0xc0] sm:$0xff] %v178_v46  ;;  %217 = vst [vmem:[#allocation5 + $0xc8] sm:$0xff] %v179_v49 }
  0x98   :  { %218 = vst [vmem:[#allocation5 + $0xd0] sm:$0xff] %v180_v52  ;;  %219 = vst [vmem:[#allocation5 + $0xd8] sm:$0xff] %v181_v55 }
  0x99   :  { %220 = vst [vmem:[#allocation5 + $0xe0] sm:$0xff] %v182_v58  ;;  %221 = vst [vmem:[#allocation5 + $0xe8] sm:$0xff] %v183_v61 }
  0x9a   :  { %222 = vst [vmem:[#allocation5 + $0xf0] sm:$0xff] %v184_v4  ;;  %223 = vst [vmem:[#allocation5 + $0xf8] sm:$0xff] %v185_v8 }
  0x9b   :  { %224 = vst [vmem:[#allocation5 + $0x100] sm:$0xff] %v186_v12  ;;  %225 = vst [vmem:[#allocation5 + $0x108] sm:$0xff] %v187_v17 }
  0x9c   :  { %226 = vst [vmem:[#allocation5 + $0x110] sm:$0xff] %v188_v21  ;;  %227 = vst [vmem:[#allocation5 + $0x118] sm:$0xff] %v189_v26 }
  0x9d   :  { %228 = vst [vmem:[#allocation5 + $0x120] sm:$0xff] %v190_v30  ;;  %229 = vst [vmem:[#allocation5 + $0x128] sm:$0xf] %v191_v35 }
  0x9e   :  { %286 = shalt.err (!%p283_p9)
}
  0x9f   :  { %241 = dma.vmem_to_hbm [thread:$0]  %s236_s13, 4864, %s556_s1, [#allocation4], %s300_s9, %s300_s9, %s301_s10  }
  0xa0   :  { %297 = dma.done.wait [#allocation4], 4864  }
  0xa1   :  { %298 = vsyncadd [#allocation4], 4294962432 }
  0xa2   :  { %245 = vsyncpa [#allocation3], 1 }
  0xa3   :  { %246 = vsyncpa [#allocation4], 1 }

</bundles_post_ra>
